<compile_context>
chip_gen: v7x
topology: tpu7x:2x2x1
jax: 0.10.0
libtpu: 0.0.40
codegen_flags: <defaults>
</compile_context>

<pallas_src>
import jax
import jax.numpy as jnp
from jax.experimental import pallas as pl
from jax.experimental.pallas import tpu as pltpu


def _painter_kernel(x_ref, w1f_ref, b1f_ref, w2_ref, b2_ref, out_ref):
    # x_ref  : (B, D)
    # w1f_ref: (D, S*H)   -- layer-1 weights of all surrogates, fused along N
    # b1f_ref: (1, S*H)   -- layer-1 biases, same fused layout
    # w2_ref : (S, H, C)  -- per-surrogate layer-2 weights
    # b2_ref : (S, 1, C)  -- per-surrogate layer-2 biases
    # out_ref: (B, S*C)   -- canvases, surrogate-major along the lane axis
    S, H, C = w2_ref.shape

    x = x_ref[...]                                                  # (B, D)
    # One wide matmul for layer 1 across all surrogates (fills the MXU N dim).
    h = jnp.dot(x, w1f_ref[...], preferred_element_type=jnp.float32)
    h = jnp.maximum(h + b1f_ref[...], 0.0)                          # (B, S*H)

    # Layer 2: small static unrolled loop; all slices are lane-aligned
    # (H and C are multiples of 128), so no masked loads/stores are emitted.
    for s in range(S):
        hs = h[:, s * H:(s + 1) * H]                                # (B, H)
        o = jnp.dot(hs, w2_ref[s], preferred_element_type=jnp.float32)
        o = jax.nn.sigmoid(o + b2_ref[s])                           # (B, C)
        out_ref[:, s * C:(s + 1) * C] = o.astype(out_ref.dtype)


def painter_surrogate(x, w1, b1, w2, b2, canvas_hw):
    """x: (B, D) float32.  Params stacked over surrogates:
         w1: (S, D, H), b1: (S, 1, H), w2: (S, H, C), b2: (S, 1, C)
       Returns (B, S, 1, Hc, Wc), the PyTorch torch.stack(..., dim=1) result."""
    S, D, H = w1.shape
    C = w2.shape[-1]
    B = x.shape[0]
    Hc, Wc = canvas_hw
    assert C == Hc * Wc

    # Host-side parameter plumbing (cheap, one-time per call):
    #   (S, D, H) -> (D, S*H) so layer 1 is a single wide matmul.
    w1f = jnp.transpose(w1, (1, 0, 2)).reshape(D, S * H)
    #   (S, 1, H) -> (1, S*H); layout (s-major, then h) matches w1f's columns.
    b1f = b1.reshape(1, S * H)

    vmem = pl.BlockSpec(memory_space=pltpu.MemorySpace.VMEM)

    # Advisory cost estimate so XLA schedules the custom call sensibly.
    flops = 2 * B * D * S * H + 2 * B * S * H * C
    bytes_accessed = 4 * (x.size + w1f.size + b1f.size + w2.size + b2.size + B * S * C)
    cost = pl.CostEstimate(flops=flops,
                           transcendentals=B * S * C,
                           bytes_accessed=bytes_accessed)

    out = pl.pallas_call(
        _painter_kernel,
        out_shape=jax.ShapeDtypeStruct((B, S * C), x.dtype),
        in_specs=[vmem, vmem, vmem, vmem, vmem],   # whole arrays resident in VMEM
        out_specs=vmem,
        cost_estimate=cost,
        compiler_params=pltpu.CompilerParams(vmem_limit_bytes=64 << 20),
    )(x, w1f, b1f, w2, b2)

    # (B, S*C) is already contiguous for (B, S, 1, Hc, Wc): metadata-only reshape.
    return out.reshape(B, S, 1, Hc, Wc)


def _reference(x, w1, b1, w2, b2, canvas_hw):
    """Plain-JAX reference for validation."""
    Hc, Wc = canvas_hw
    h = jnp.maximum(jnp.einsum("bd,sdh->sbh", x, w1) + b1, 0.0)
    o = jax.nn.sigmoid(jnp.einsum("sbh,shc->sbc", h, w2) + b2)
    B = x.shape[0]
    S = w1.shape[0]
    return jnp.transpose(o, (1, 0, 2)).reshape(B, S, 1, Hc, Wc)


if __name__ == "__main__":
    # Small, TPU-tile-friendly shapes (B multiple of 8; H, C multiples of 128):
    B = 8         # batch of stroke-parameter vectors
    D = 32        # stroke parameter dim
    H = 128       # surrogate hidden dim
    Hc = Wc = 16  # canvas spatial size
    C = Hc * Wc   # flattened canvas = 256
    S = 4         # number of surrogates in the ModuleList

    key = jax.random.PRNGKey(0)
    kx, k1, k2, k3, k4 = jax.random.split(key, 5)

    x = jax.random.normal(kx, (B, D), dtype=jnp.float32)
    # Deterministic synthetic parameters for each surrogate (no checkpoint load).
    w1 = jax.random.normal(k1, (S, D, H), dtype=jnp.float32) * (1.0 / jnp.sqrt(D))
    b1 = jax.random.normal(k2, (S, 1, H), dtype=jnp.float32) * 0.01
    w2 = jax.random.normal(k3, (S, H, C), dtype=jnp.float32) * (1.0 / jnp.sqrt(H))
    b2 = jax.random.normal(k4, (S, 1, C), dtype=jnp.float32) * 0.01

    canvases = painter_surrogate(x, w1, b1, w2, b2, (Hc, Wc))
    canvases = jax.block_until_ready(canvases)

    ref = _reference(x, w1, b1, w2, b2, (Hc, Wc))
    assert canvases.shape == (B, S, 1, Hc, Wc), canvases.shape
    assert jnp.allclose(canvases, ref, atol=1e-5, rtol=1e-5)

    print("KERNEL_OK")
</pallas_src>

<mosaic_0001>
module attributes {stable_mosaic.version = 11 : i64} {
  func.func @_painter_kernel(%arg0: memref<8x32xf32, #tpu.memory_space<vmem>>, %arg1: memref<32x512xf32, #tpu.memory_space<vmem>>, %arg2: memref<1x512xf32, #tpu.memory_space<vmem>>, %arg3: memref<4x128x256xf32, #tpu.memory_space<vmem>>, %arg4: memref<4x1x256xf32, #tpu.memory_space<vmem>>, %arg5: memref<8x1024xf32, #tpu.memory_space<vmem>>) attributes {dimension_semantics = [], scalar_prefetch = 0 : i64, scratch_operands = 0 : i64, tpu.core_type = #tpu.core_type<tc>} {
    %c0 = arith.constant 0 : index
    %c0_0 = arith.constant 0 : index
    %0 = vector.load %arg0[%c0, %c0_0] : memref<8x32xf32, #tpu.memory_space<vmem>>, vector<8x32xf32>
    %c0_1 = arith.constant 0 : index
    %c0_2 = arith.constant 0 : index
    %1 = vector.load %arg1[%c0_1, %c0_2] : memref<32x512xf32, #tpu.memory_space<vmem>>, vector<32x512xf32>
    %cst = arith.constant dense<0.000000e+00> : vector<8x512xf32>
    %2 = tpu.matmul %0, %1, %cst {dimension_numbers = #tpu.dot_dimension_numbers<[1], [0], [0], [1], [0, 0, 1, 1], [], []>} : vector<8x32xf32>, vector<32x512xf32>, vector<8x512xf32> -> vector<8x512xf32>
    %c0_3 = arith.constant 0 : index
    %c0_4 = arith.constant 0 : index
    %3 = vector.load %arg2[%c0_3, %c0_4] : memref<1x512xf32, #tpu.memory_space<vmem>>, vector<1x512xf32>
    %4 = vector.broadcast %3 : vector<1x512xf32> to vector<8x512xf32>
    %5 = arith.addf %2, %4 : vector<8x512xf32>
    %cst_5 = arith.constant 0.000000e+00 : f32
    %6 = vector.broadcast %cst_5 : f32 to vector<8x512xf32>
    %7 = arith.maximumf %5, %6 : vector<8x512xf32>
    %8 = vector.extract_strided_slice %7 {offsets = [0, 0], sizes = [8, 128], strides = [1, 1]} : vector<8x512xf32> to vector<8x128xf32>
    %c0_6 = arith.constant 0 : index
    %c0_7 = arith.constant 0 : index
    %c0_8 = arith.constant 0 : index
    %9 = vector.load %arg3[%c0_6, %c0_7, %c0_8] : memref<4x128x256xf32, #tpu.memory_space<vmem>>, vector<1x128x256xf32>
    %10 = vector.shape_cast %9 : vector<1x128x256xf32> to vector<128x256xf32>
    %cst_9 = arith.constant dense<0.000000e+00> : vector<8x256xf32>
    %11 = tpu.matmul %8, %10, %cst_9 {dimension_numbers = #tpu.dot_dimension_numbers<[1], [0], [0], [1], [0, 0, 1, 1], [], []>} : vector<8x128xf32>, vector<128x256xf32>, vector<8x256xf32> -> vector<8x256xf32>
    %c0_10 = arith.constant 0 : index
    %c0_11 = arith.constant 0 : index
    %c0_12 = arith.constant 0 : index
    %12 = vector.load %arg4[%c0_10, %c0_11, %c0_12] : memref<4x1x256xf32, #tpu.memory_space<vmem>>, vector<1x1x256xf32>
    %13 = vector.shape_cast %12 : vector<1x1x256xf32> to vector<1x256xf32>
    %14 = vector.broadcast %13 : vector<1x256xf32> to vector<8x256xf32>
    %15 = arith.addf %11, %14 : vector<8x256xf32>
    %16 = arith.negf %15 : vector<8x256xf32>
    %17 = math.exp %16 : vector<8x256xf32>
    %cst_13 = arith.constant 1.000000e+00 : f32
    %18 = vector.broadcast %cst_13 : f32 to vector<8x256xf32>
    %19 = arith.addf %18, %17 : vector<8x256xf32>
    %20 = arith.divf %18, %19 : vector<8x256xf32>
    %c0_14 = arith.constant 0 : index
    %c0_15 = arith.constant 0 : index
    %21 = vector.load %arg5[%c0_14, %c0_15] : memref<8x1024xf32, #tpu.memory_space<vmem>>, vector<8x256xf32>
    tpu.vector_store %arg5[%c0_14, %c0_15], %20 {strides = array<i32>} : memref<8x1024xf32, #tpu.memory_space<vmem>>, vector<8x256xf32>,
    %22 = vector.extract_strided_slice %7 {offsets = [0, 128], sizes = [8, 128], strides = [1, 1]} : vector<8x512xf32> to vector<8x128xf32>
    %c1 = arith.constant 1 : index
    %c0_16 = arith.constant 0 : index
    %c0_17 = arith.constant 0 : index
    %23 = vector.load %arg3[%c1, %c0_16, %c0_17] : memref<4x128x256xf32, #tpu.memory_space<vmem>>, vector<1x128x256xf32>
    %24 = vector.shape_cast %23 : vector<1x128x256xf32> to vector<128x256xf32>
    %cst_18 = arith.constant dense<0.000000e+00> : vector<8x256xf32>
    %25 = tpu.matmul %22, %24, %cst_18 {dimension_numbers = #tpu.dot_dimension_numbers<[1], [0], [0], [1], [0, 0, 1, 1], [], []>} : vector<8x128xf32>, vector<128x256xf32>, vector<8x256xf32> -> vector<8x256xf32>
    %c1_19 = arith.constant 1 : index
    %c0_20 = arith.constant 0 : index
    %c0_21 = arith.constant 0 : index
    %26 = vector.load %arg4[%c1_19, %c0_20, %c0_21] : memref<4x1x256xf32, #tpu.memory_space<vmem>>, vector<1x1x256xf32>
    %27 = vector.shape_cast %26 : vector<1x1x256xf32> to vector<1x256xf32>
    %28 = vector.broadcast %27 : vector<1x256xf32> to vector<8x256xf32>
    %29 = arith.addf %25, %28 : vector<8x256xf32>
    %30 = arith.negf %29 : vector<8x256xf32>
    %31 = math.exp %30 : vector<8x256xf32>
    %cst_22 = arith.constant 1.000000e+00 : f32
    %32 = vector.broadcast %cst_22 : f32 to vector<8x256xf32>
    %33 = arith.addf %32, %31 : vector<8x256xf32>
    %34 = arith.divf %32, %33 : vector<8x256xf32>
    %c0_23 = arith.constant 0 : index
    %c256 = arith.constant 256 : index
    %35 = vector.load %arg5[%c0_23, %c256] : memref<8x1024xf32, #tpu.memory_space<vmem>>, vector<8x256xf32>
    tpu.vector_store %arg5[%c0_23, %c256], %34 {strides = array<i32>} : memref<8x1024xf32, #tpu.memory_space<vmem>>, vector<8x256xf32>,
    %36 = vector.extract_strided_slice %7 {offsets = [0, 256], sizes = [8, 128], strides = [1, 1]} : vector<8x512xf32> to vector<8x128xf32>
    %c2 = arith.constant 2 : index
    %c0_24 = arith.constant 0 : index
    %c0_25 = arith.constant 0 : index
    %37 = vector.load %arg3[%c2, %c0_24, %c0_25] : memref<4x128x256xf32, #tpu.memory_space<vmem>>, vector<1x128x256xf32>
    %38 = vector.shape_cast %37 : vector<1x128x256xf32> to vector<128x256xf32>
    %cst_26 = arith.constant dense<0.000000e+00> : vector<8x256xf32>
    %39 = tpu.matmul %36, %38, %cst_26 {dimension_numbers = #tpu.dot_dimension_numbers<[1], [0], [0], [1], [0, 0, 1, 1], [], []>} : vector<8x128xf32>, vector<128x256xf32>, vector<8x256xf32> -> vector<8x256xf32>
    %c2_27 = arith.constant 2 : index
    %c0_28 = arith.constant 0 : index
    %c0_29 = arith.constant 0 : index
    %40 = vector.load %arg4[%c2_27, %c0_28, %c0_29] : memref<4x1x256xf32, #tpu.memory_space<vmem>>, vector<1x1x256xf32>
    %41 = vector.shape_cast %40 : vector<1x1x256xf32> to vector<1x256xf32>
    %42 = vector.broadcast %41 : vector<1x256xf32> to vector<8x256xf32>
    %43 = arith.addf %39, %42 : vector<8x256xf32>
    %44 = arith.negf %43 : vector<8x256xf32>
    %45 = math.exp %44 : vector<8x256xf32>
    %cst_30 = arith.constant 1.000000e+00 : f32
    %46 = vector.broadcast %cst_30 : f32 to vector<8x256xf32>
    %47 = arith.addf %46, %45 : vector<8x256xf32>
    %48 = arith.divf %46, %47 : vector<8x256xf32>
    %c0_31 = arith.constant 0 : index
    %c512 = arith.constant 512 : index
    %49 = vector.load %arg5[%c0_31, %c512] : memref<8x1024xf32, #tpu.memory_space<vmem>>, vector<8x256xf32>
    tpu.vector_store %arg5[%c0_31, %c512], %48 {strides = array<i32>} : memref<8x1024xf32, #tpu.memory_space<vmem>>, vector<8x256xf32>,
    %50 = vector.extract_strided_slice %7 {offsets = [0, 384], sizes = [8, 128], strides = [1, 1]} : vector<8x512xf32> to vector<8x128xf32>
    %c3 = arith.constant 3 : index
    %c0_32 = arith.constant 0 : index
    %c0_33 = arith.constant 0 : index
    %51 = vector.load %arg3[%c3, %c0_32, %c0_33] : memref<4x128x256xf32, #tpu.memory_space<vmem>>, vector<1x128x256xf32>
    %52 = vector.shape_cast %51 : vector<1x128x256xf32> to vector<128x256xf32>
    %cst_34 = arith.constant dense<0.000000e+00> : vector<8x256xf32>
    %53 = tpu.matmul %50, %52, %cst_34 {dimension_numbers = #tpu.dot_dimension_numbers<[1], [0], [0], [1], [0, 0, 1, 1], [], []>} : vector<8x128xf32>, vector<128x256xf32>, vector<8x256xf32> -> vector<8x256xf32>
    %c3_35 = arith.constant 3 : index
    %c0_36 = arith.constant 0 : index
    %c0_37 = arith.constant 0 : index
    %54 = vector.load %arg4[%c3_35, %c0_36, %c0_37] : memref<4x1x256xf32, #tpu.memory_space<vmem>>, vector<1x1x256xf32>
    %55 = vector.shape_cast %54 : vector<1x1x256xf32> to vector<1x256xf32>
    %56 = vector.broadcast %55 : vector<1x256xf32> to vector<8x256xf32>
    %57 = arith.addf %53, %56 : vector<8x256xf32>
    %58 = arith.negf %57 : vector<8x256xf32>
    %59 = math.exp %58 : vector<8x256xf32>
    %cst_38 = arith.constant 1.000000e+00 : f32
    %60 = vector.broadcast %cst_38 : f32 to vector<8x256xf32>
    %61 = arith.addf %60, %59 : vector<8x256xf32>
    %62 = arith.divf %60, %61 : vector<8x256xf32>
    %c0_39 = arith.constant 0 : index
    %c768 = arith.constant 768 : index
    %63 = vector.load %arg5[%c0_39, %c768] : memref<8x1024xf32, #tpu.memory_space<vmem>>, vector<8x256xf32>
    tpu.vector_store %arg5[%c0_39, %c768], %62 {strides = array<i32>} : memref<8x1024xf32, #tpu.memory_space<vmem>>, vector<8x256xf32>,
    return
  }
}

</mosaic_0001>

<bundles_post_ra>
// kernel: tpu_custom_call.1
= control target key start
LH: loop header
LB: loop body
LE: loop exit
PB: predicated region body
PF: predicated region fallthrough
CT: control target
= control target key end

     0   :  { %10 = vsyncpa [#allocation3], 0  ;;  %s1308_s0 = inlined_call_operand.hbm [shape: f32[8,32], index: 0, kind: input, shape index: {}]   ;;  %s1309_s1 = inlined_call_operand.hbm [shape: f32[32,512], index: 1, kind: input, shape index: {}]   ;;  %s1310_s2 = inlined_call_operand.hbm [shape: f32[1,512], index: 2, kind: input, shape index: {}]   ;;  %s1311_s3 = inlined_call_operand.hbm [shape: f32[4,128,256], index: 3, kind: input, shape index: {}]   ;;  %s1312_s4 = inlined_call_operand.hbm [shape: f32[4,1,256], index: 4, kind: input, shape index: {}]   ;;  %s1313_s5 = inlined_call_operand.hbm [shape: f32[8,1024], index: 5, kind: output, shape index: {}]  }
   0x1   :  { %11 = vsyncpa [#allocation6], 0 }
   0x2   :  { %12 = vsyncpa [#allocation9], 0 }
   0x3   :  { %13 = vsyncpa [#allocation4], 0  ;;  %s1151_s18 = smov [#allocation5]   ;;  %s1011_s22 = scalar_lea.hbm %s1309_s1, 2048 }
   0x4   :  { %s29_s19 = sshll.u32 %s1151_s18, 4  ;;  %p1012_p0 = scmp.ne.s32.totalorder %s1309_s1, %s1011_s22  ;;  %s30_s19 = int_to_ptr.vmem [resolvable:$true] %s29_s19 }
   0x5   :  { %p1015_p1 = scmp.lt.u32.totalorder %s1011_s22, %s1309_s1 }
   0x7   :  { %p1017_p2 = pnand %p1015_p1, %p1012_p0 }
   0x9   :  { %1020 = shalt.err (!%p1017_p2)
}
   0xa   :  { %s1021_s27 = scalar_lea.vmem %s30_s19, 2048  ;;  %p1026_p4 = scmp.lt.s32.totalorder %s30_s19, %s30_s19 }
   0xb   :  { %p1022_p3 = scmp.ne.s32.totalorder %s30_s19, %s1021_s27  ;;  %p1027_p5 = scmp.lt.s32.totalorder %s1021_s27, %s1021_s27 }
   0xd   :  { %p1028_p6 = por %p1027_p5, %p1026_p4 }
   0xf   :  { %p1029_p7 = pnand %p1028_p6, %p1022_p3 }
  0x11   :  { %1032 = shalt.err (!%p1029_p7)
}
  0x12   :  { %s1152_s28 = smov 512   ;;  %s1153_s29 = smov 32  }
  0x13   :  { %35 = dma.hbm_to_vmem [thread:$0]  %s1309_s1, 2048, %s30_s19, [#allocation6], %s1152_s28, %s1152_s28, %s1153_s29  }
  0x14   :  { %s1154_s7 = smov [#allocation8]   ;;  %s1033_s11 = scalar_lea.hbm %s1311_s3, 16384 }
  0x15   :  { %s51_s8 = sshll.u32 %s1154_s7, 4  ;;  %p1034_p8 = scmp.ne.s32.totalorder %s1311_s3, %s1033_s11  ;;  %s52_s8 = int_to_ptr.vmem [resolvable:$true] %s51_s8 }
  0x16   :  { %p1037_p9 = scmp.lt.u32.totalorder %s1033_s11, %s1311_s3 }
  0x18   :  { %p1039_p10 = pnand %p1037_p9, %p1034_p8 }
  0x1a   :  { %1042 = shalt.err (!%p1039_p10)
}
  0x1b   :  { %s1043_s16 = scalar_lea.vmem %s52_s8, 16384  ;;  %p1048_p12 = scmp.lt.s32.totalorder %s52_s8, %s52_s8 }
  0x1c   :  { %p1044_p11 = scmp.ne.s32.totalorder %s52_s8, %s1043_s16  ;;  %p1049_p13 = scmp.lt.s32.totalorder %s1043_s16, %s1043_s16 }
  0x1e   :  { %p1050_p0 = por %p1049_p13, %p1048_p12 }
  0x20   :  { %p1051_p1 = pnand %p1050_p0, %p1044_p11 }
  0x22   :  { %1054 = shalt.err (!%p1051_p1)
}
  0x23   :  { %s1155_s1 = smov 256   ;;  %s1156_s17 = smov 16  }
  0x24   :  { %57 = dma.hbm_to_vmem [thread:$0]  %s1311_s3, 16384, %s52_s8, [#allocation9], %s1155_s1, %s1155_s1, %s1156_s17  }
  0x25   :  { %s1157_s20 = smov [#allocation2]   ;;  %s1158_s22 = smov [#allocation7]  }
  0x26   :  { %s20_s21 = sshll.u32 %s1157_s20, 4  ;;  %s42_s23 = sshll.u32 %s1158_s22, 4  ;;  %s21_s21 = int_to_ptr.vmem [resolvable:$true] %s20_s21  ;;  %s43_s23 = int_to_ptr.vmem [resolvable:$true] %s42_s23 }
  0x27   :  { %s1055_s26 = scalar_lea.hbm %s1308_s0, 128 }
  0x28   :  { %p1056_p2 = scmp.ne.s32.totalorder %s1308_s0, %s1055_s26  ;;  %p1059_p3 = scmp.lt.u32.totalorder %s1055_s26, %s1308_s0 }
  0x2a   :  { %p1061_p4 = pnand %p1059_p3, %p1056_p2 }
  0x2c   :  { %1064 = shalt.err (!%p1061_p4)
}
  0x2d   :  { %s1065_s3 = scalar_lea.vmem %s21_s21, 128  ;;  %p1070_p6 = scmp.lt.s32.totalorder %s21_s21, %s21_s21 }
  0x2e   :  { %p1066_p5 = scmp.ne.s32.totalorder %s21_s21, %s1065_s3  ;;  %p1071_p7 = scmp.lt.s32.totalorder %s1065_s3, %s1065_s3 }
  0x30   :  { %p1072_p8 = por %p1071_p7, %p1070_p6 }
  0x32   :  { %p1073_p9 = pnand %p1072_p8, %p1066_p5 }
  0x34   :  { %1076 = shalt.err (!%p1073_p9)
}
  0x35   :  { %23 = dma.hbm_to_vmem [thread:$0]  %s1308_s0, 128, %s21_s21, [#allocation3]  }
  0x36   :  { %s1077_s11 = scalar_lea.hbm %s1310_s2, 64 }
  0x37   :  { %p1078_p10 = scmp.ne.s32.totalorder %s1310_s2, %s1077_s11  ;;  %p1081_p11 = scmp.lt.u32.totalorder %s1077_s11, %s1310_s2 }
  0x39   :  { %p1083_p12 = pnand %p1081_p11, %p1078_p10 }
  0x3b   :  { %1086 = shalt.err (!%p1083_p12)
}
  0x3c   :  { %s1087_s16 = scalar_lea.vmem %s43_s23, 64  ;;  %p1092_p0 = scmp.lt.s32.totalorder %s43_s23, %s43_s23 }
  0x3d   :  { %p1088_p13 = scmp.ne.s32.totalorder %s43_s23, %s1087_s16  ;;  %p1093_p1 = scmp.lt.s32.totalorder %s1087_s16, %s1087_s16 }
  0x3f   :  { %p1094_p2 = por %p1093_p1, %p1092_p0 }
  0x41   :  { %p1095_p3 = pnand %p1094_p2, %p1088_p13 }
  0x43   :  { %1098 = shalt.err (!%p1095_p3)
}
  0x44   :  { %45 = dma.hbm_to_vmem [thread:$0]  %s1310_s2, 64, %s43_s23, [#allocation6]  }
  0x45   :  { %s1159_s17 = smov [#allocation10]   ;;  %s1099_s21 = scalar_lea.hbm %s1312_s4, 128 }
  0x46   :  { %s63_s18 = sshll.u32 %s1159_s17, 4  ;;  %p1100_p4 = scmp.ne.s32.totalorder %s1312_s4, %s1099_s21  ;;  %s64_s18 = int_to_ptr.vmem [resolvable:$true] %s63_s18 }
  0x47   :  { %p1103_p5 = scmp.lt.u32.totalorder %s1099_s21, %s1312_s4 }
  0x49   :  { %p1105_p6 = pnand %p1103_p5, %p1100_p4 }
  0x4b   :  { %1108 = shalt.err (!%p1105_p6)
}
  0x4c   :  { %s1109_s27 = scalar_lea.vmem %s64_s18, 128  ;;  %p1114_p8 = scmp.lt.s32.totalorder %s64_s18, %s64_s18 }
  0x4d   :  { %p1110_p7 = scmp.ne.s32.totalorder %s64_s18, %s1109_s27  ;;  %p1115_p9 = scmp.lt.s32.totalorder %s1109_s27, %s1109_s27 }
  0x4f   :  { %p1116_p10 = por %p1115_p9, %p1114_p8 }
  0x51   :  { %p1117_p11 = pnand %p1116_p10, %p1110_p7 }
  0x53   :  { %1120 = shalt.err (!%p1117_p11)
}
  0x54   :  { %s1160_s2 = smov 2  }
  0x55   :  { %69 = dma.hbm_to_vmem [thread:$0]  %s1312_s4, 128, %s64_s18, [#allocation9], %s1153_s29, %s1153_s29, %s1160_s2  }
  0x56   :  { %1143 = dma.done.wait [#allocation3], 128  }
  0x57   :  { %1144 = vsyncadd [#allocation3], 4294967168 }
  0x58   :  { %1145 = dma.done.wait [#allocation6], 2112  }
  0x59   :  { %1146 = vsyncadd [#allocation6], 4294965184 }
  0x5a   :  { %1147 = dma.done.wait [#allocation9], 16512  }
  0x5b   :  { %1148 = vsyncadd [#allocation9], 4294950784  ;;  %v1161_v0 = vmov 0.0   ;;  %v87_v1 = vld [vmem:[#allocation5 + $0x8] sm:$0xff]  ;;  %v86_v3 = vld [vmem:[#allocation5] sm:$0xff]  ;;  %vm124_vm0 = vcmask 261120  }
  0x5c   :  { %192 = vmatprep.mubr.f32.mxu0 %v1161_v0  ;;  %263 = vmatprep.mubr.f32.mxu1 %v1161_v0  ;;  %v91_v2 = vld [vmem:[#allocation5 + $0x28] sm:$0xff]  ;;  %v90_v5 = vld [vmem:[#allocation5 + $0x20] sm:$0xff]  ;;  %v89_v12 = vld [vmem:[#allocation5 + $0x18] sm:$0xff]  ;;  %s1162_s4 = smov [#allocation11]  }
  0x5d   :  { %v823_v4 = vpack.c.bf16 %v91_v2, %v87_v1  ;;  %v95_v6 = vld [vmem:[#allocation5 + $0x48] sm:$0xff]  ;;  %v825_v8 = vpack.c.bf16 %v90_v5, %v86_v3  ;;  %v94_v10 = vld [vmem:[#allocation5 + $0x40] sm:$0xff]  ;;  %v93_v13 = vld [vmem:[#allocation5 + $0x38] sm:$0xff]  ;;  %s802_s29 = sshll.u32 %s1162_s4, 4  ;;  %s803_s29 = int_to_ptr.vmem [resolvable:$true] %s802_s29 }
  0x5e   :  { %v99_v7 = vld [vmem:[#allocation5 + $0x68] sm:$0xff]  ;;  %v98_v11 = vld [vmem:[#allocation5 + $0x60] sm:$0xff]  ;;  %v88_v14 = vld [vmem:[#allocation5 + $0x10] sm:$0xff]  ;;  %v831_v16 = vpack.c.bf16 %v93_v13, %v89_v12  ;;  %s1121_s30 = scalar_lea.vmem %s803_s29, 1024  ;;  %p1126_p13 = scmp.lt.s32.totalorder %s803_s29, %s803_s29 }
  0x5f   :  { %v827_v9 = vpack.c.bf16 %v99_v7, %v95_v6  ;;  %824 = vmatprep.subr.bf16.mxu0 %v823_v4  ;;  %v829_v15 = vpack.c.bf16 %v98_v11, %v94_v10  ;;  %v92_v17 = vld [vmem:[#allocation5 + $0x30] sm:$0xff]  ;;  %v97_v18 = vld [vmem:[#allocation5 + $0x58] sm:$0xff]  ;;  %v274_v27 = vld [vmem:[#allocation8] sm:$0xff]  ;;  %p1122_p12 = scmp.ne.s32.totalorder %s803_s29, %s1121_s30  ;;  %p1127_p0 = scmp.lt.s32.totalorder %s1121_s30, %s1121_s30 }
  0x60   :  { %826 = vmatpush1.bf16.msra.mxu0 %v825_v8  ;;  %v101_v19 = vld [vmem:[#allocation5 + $0x78] sm:$0xff]  ;;  %v833_v20 = vpack.c.bf16 %v92_v17, %v88_v14  ;;  %v96_v22 = vld [vmem:[#allocation5 + $0x50] sm:$0xff]  ;;  %832 = vmatprep.subr.bf16.mxu1 %v831_v16  ;;  %v404_v33 = vld [vmem:[#allocation8 + $0x100] sm:$0xff] }
  0x61   :  { %828 = vmatprep.subr.bf16.mxu0 %v827_v9  ;;  %v835_v21 = vpack.c.bf16 %v101_v19, %v97_v18  ;;  %v100_v23 = vld [vmem:[#allocation5 + $0x70] sm:$0xff]  ;;  %v85_v25 = vld [vmem:[#allocation2] sm:$0xff]  ;;  %v278_v40 = vld [vmem:[#allocation8 + $0x20] sm:$0xff]  ;;  %p1128_p1 = por %p1127_p0, %p1126_p13 }
  0x62   :  { %v275_v24 = vld [vmem:[#allocation8 + $0x8] sm:$0xff]  ;;  %v277_v26 = vld [vmem:[#allocation8 + $0x18] sm:$0xff]  ;;  %v276_v28 = vld [vmem:[#allocation8 + $0x10] sm:$0xff]  ;;  %834 = vmatpush1.bf16.msra.mxu1 %v833_v20  ;;  %v837_v29 = vpack.c.bf16 %v100_v23, %v96_v22 }
  0x63   :  { %v839_v30 = vpack.c.bf16 %v277_v26, %v275_v24  ;;  %v405_v31 = vld [vmem:[#allocation8 + $0x108] sm:$0xff]  ;;  %v407_v32 = vld [vmem:[#allocation8 + $0x118] sm:$0xff]  ;;  %836 = vmatprep.subr.bf16.mxu1 %v835_v21  ;;  %v841_v34 = vpack.c.bf16 %v276_v28, %v274_v27  ;;  %v406_v36 = vld [vmem:[#allocation8 + $0x110] sm:$0xff]  ;;  %p1129_p2 = pnand %p1128_p1, %p1122_p12 }
  0x64   :  { %830 = vmatpush1.bf16.msra.mxu0 %v829_v15  ;;  %v871_v35 = vpack.c.bf16 %v407_v32, %v405_v31  ;;  %v279_v37 = vld [vmem:[#allocation8 + $0x28] sm:$0xff]  ;;  %v281_v38 = vld [vmem:[#allocation8 + $0x38] sm:$0xff]  ;;  %v280_v41 = vld [vmem:[#allocation8 + $0x30] sm:$0xff]  ;;  %v873_v44 = vpack.c.bf16 %v406_v36, %v404_v33 }
  0x65   :  { %840 = vmatprep.subr.bf16.mxu0 %v839_v30  ;;  %v843_v39 = vpack.c.bf16 %v281_v38, %v279_v37  ;;  %v409_v42 = vld [vmem:[#allocation8 + $0x128] sm:$0xff]  ;;  %v411_v43 = vld [vmem:[#allocation8 + $0x138] sm:$0xff]  ;;  %v845_v47 = vpack.c.bf16 %v280_v41, %v278_v40  ;;  %v408_v49 = vld [vmem:[#allocation8 + $0x120] sm:$0xff] }
  0x66   :  { %838 = vmatpush1.bf16.msra.mxu1 %v837_v29  ;;  %v283_v45 = vld [vmem:[#allocation8 + $0x48] sm:$0xff]  ;;  %v285_v46 = vld [vmem:[#allocation8 + $0x58] sm:$0xff]  ;;  %v875_v48 = vpack.c.bf16 %v411_v43, %v409_v42  ;;  %v410_v50 = vld [vmem:[#allocation8 + $0x130] sm:$0xff] }
  0x67   :  { %813 = vmatmul.mubr.msk.f32.vlgmr.msra.gmra.mrb[0].mxu0 %vm124_vm0, %v85_v25  ;;  %872 = vmatprep.subr.bf16.mxu1 %v871_v35  ;;  %v282_v51 = vld [vmem:[#allocation8 + $0x40] sm:$0xff]  ;;  %v847_v52 = vpack.c.bf16 %v285_v46, %v283_v45  ;;  %v284_v53 = vld [vmem:[#allocation8 + $0x50] sm:$0xff]  ;;  %v413_v54 = vld [vmem:[#allocation8 + $0x148] sm:$0xff]  ;;  %v877_v58 = vpack.c.bf16 %v410_v50, %v408_v49 }
  0x68   :  { %842 = vmatpush1.bf16.msra.mxu0 %v841_v34  ;;  %v415_v55 = vld [vmem:[#allocation8 + $0x158] sm:$0xff]  ;;  %382 = vmatprep.mubr.f32.mxu0 %v1161_v0  ;;  %v287_v56 = vld [vmem:[#allocation8 + $0x68] sm:$0xff]  ;;  %v849_v59 = vpack.c.bf16 %v284_v53, %v282_v51  ;;  %v412_v61 = vld [vmem:[#allocation8 + $0x140] sm:$0xff] }
  0x69   :  { %844 = vmatprep.subr.bf16.mxu0 %v843_v39  ;;  %814 = vmatmul.mubr.msk.f32.vlgmr.msra.gmra.mrb[0].mxu1 %vm124_vm0, %v85_v25  ;;  %v289_v57 = vld [vmem:[#allocation8 + $0x78] sm:$0xff]  ;;  %v879_v60 = vpack.c.bf16 %v415_v55, %v413_v54  ;;  %v414_v62 = vld [vmem:[#allocation8 + $0x150] sm:$0xff]  ;;  %v286_v63 = vld [vmem:[#allocation8 + $0x60] sm:$0xff] }
  0x6a   :  { %874 = vmatpush1.bf16.msra.mxu1 %v873_v44  ;;  %513 = vmatprep.mubr.f32.mxu1 %v1161_v0  ;;  %v851_v1 = vpack.c.bf16 %v289_v57, %v287_v56  ;;  %v288_v2 = vld [vmem:[#allocation8 + $0x70] sm:$0xff]  ;;  %v417_v3 = vld [vmem:[#allocation8 + $0x168] sm:$0xff]  ;;  %v419_v4 = vld [vmem:[#allocation8 + $0x178] sm:$0xff]  ;;  %v881_v7 = vpack.c.bf16 %v414_v62, %v412_v61 }
  0x6b   :  { %876 = vmatprep.subr.bf16.mxu1 %v875_v48  ;;  %v291_v5 = vld [vmem:[#allocation8 + $0x88] sm:$0xff]  ;;  %v293_v6 = vld [vmem:[#allocation8 + $0x98] sm:$0xff]  ;;  %v853_v8 = vpack.c.bf16 %v288_v2, %v286_v63  ;;  %v883_v9 = vpack.c.bf16 %v419_v4, %v417_v3  ;;  %v416_v10 = vld [vmem:[#allocation8 + $0x160] sm:$0xff]  ;;  %v104_v2 = vlaneseq }
  0x6c   :  { %846 = vmatpush1.bf16.msra.mxu0 %v845_v47  ;;  %v418_v11 = vld [vmem:[#allocation8 + $0x170] sm:$0xff]  ;;  %v290_v12 = vld [vmem:[#allocation8 + $0x80] sm:$0xff]  ;;  %v855_v13 = vpack.c.bf16 %v293_v6, %v291_v5  ;;  %v421_v15 = vld [vmem:[#allocation8 + $0x188] sm:$0xff] }
  0x6d   :  { %848 = vmatprep.subr.bf16.mxu0 %v847_v52  ;;  %v292_v14 = vld [vmem:[#allocation8 + $0x90] sm:$0xff]  ;;  %v423_v16 = vld [vmem:[#allocation8 + $0x198] sm:$0xff]  ;;  %v295_v17 = vld [vmem:[#allocation8 + $0xa8] sm:$0xff]  ;;  %v885_v19 = vpack.c.bf16 %v418_v11, %v416_v10  ;;  %v1262_v3 = vshrl.u32 %v104_v2, 7 }
  0x6e   :  { %878 = vmatpush1.bf16.msra.mxu1 %v877_v58  ;;  %v297_v18 = vld [vmem:[#allocation8 + $0xb8] sm:$0xff]  ;;  %v857_v20 = vpack.c.bf16 %v292_v14, %v290_v12  ;;  %v887_v21 = vpack.c.bf16 %v423_v16, %v421_v15  ;;  %v420_v22 = vld [vmem:[#allocation8 + $0x180] sm:$0xff]  ;;  %v422_v23 = vld [vmem:[#allocation8 + $0x190] sm:$0xff] }
  0x6f   :  { %880 = vmatprep.subr.bf16.mxu1 %v879_v60  ;;  %v294_v24 = vld [vmem:[#allocation8 + $0xa0] sm:$0xff]  ;;  %v859_v25 = vpack.c.bf16 %v297_v18, %v295_v17  ;;  %v296_v26 = vld [vmem:[#allocation8 + $0xb0] sm:$0xff]  ;;  %v425_v27 = vld [vmem:[#allocation8 + $0x1a8] sm:$0xff]  ;;  %v889_v31 = vpack.c.bf16 %v422_v23, %v420_v22  ;;  %v1265_v4 = vsub.s32 0, %v1262_v3  ;;  %v1270_v6 = vsub.s32 1, %v1262_v3 }
  0x70   :  { %850 = vmatpush1.bf16.msra.mxu0 %v849_v59  ;;  %v427_v28 = vld [vmem:[#allocation8 + $0x1b8] sm:$0xff]  ;;  %v299_v29 = vld [vmem:[#allocation8 + $0xc8] sm:$0xff]  ;;  %v861_v32 = vpack.c.bf16 %v296_v26, %v294_v24  ;;  %v424_v34 = vld [vmem:[#allocation8 + $0x1a0] sm:$0xff] }
  0x71   :  { %852 = vmatprep.subr.bf16.mxu0 %v851_v1  ;;  %v301_v30 = vld [vmem:[#allocation8 + $0xd8] sm:$0xff]  ;;  %v891_v33 = vpack.c.bf16 %v427_v28, %v425_v27  ;;  %v426_v35 = vld [vmem:[#allocation8 + $0x1b0] sm:$0xff]  ;;  %v298_v36 = vld [vmem:[#allocation8 + $0xc0] sm:$0xff] }
  0x72   :  { %882 = vmatpush1.bf16.msra.mxu1 %v881_v7  ;;  %v863_v37 = vpack.c.bf16 %v301_v30, %v299_v29  ;;  %v300_v38 = vld [vmem:[#allocation8 + $0xd0] sm:$0xff]  ;;  %v429_v39 = vld [vmem:[#allocation8 + $0x1c8] sm:$0xff]  ;;  %v431_v40 = vld [vmem:[#allocation8 + $0x1d8] sm:$0xff]  ;;  %v893_v41 = vpack.c.bf16 %v426_v35, %v424_v34 }
  0x73   :  { %884 = vmatprep.subr.bf16.mxu1 %v883_v9  ;;  %v865_v42 = vpack.c.bf16 %v300_v38, %v298_v36  ;;  %v895_v43 = vpack.c.bf16 %v431_v40, %v429_v39  ;;  %v428_v44 = vld [vmem:[#allocation8 + $0x1c0] sm:$0xff]  ;;  %v430_v45 = vld [vmem:[#allocation8 + $0x1d0] sm:$0xff]  ;;  %v303_v47 = vld [vmem:[#allocation8 + $0xe8] sm:$0xff] }
  0x74   :  { %854 = vmatpush1.bf16.msra.mxu0 %v853_v8  ;;  %v897_v46 = vpack.c.bf16 %v430_v45, %v428_v44  ;;  %v305_v48 = vld [vmem:[#allocation8 + $0xf8] sm:$0xff]  ;;  %v302_v50 = vld [vmem:[#allocation8 + $0xe0] sm:$0xff]  ;;  %v304_v51 = vld [vmem:[#allocation8 + $0xf0] sm:$0xff] }
  0x75   :  { %856 = vmatprep.subr.bf16.mxu0 %v855_v13  ;;  %v867_v49 = vpack.c.bf16 %v305_v48, %v303_v47  ;;  %v433_v52 = vld [vmem:[#allocation8 + $0x1e8] sm:$0xff]  ;;  %v869_v53 = vpack.c.bf16 %v304_v51, %v302_v50  ;;  %v435_v54 = vld [vmem:[#allocation8 + $0x1f8] sm:$0xff]  ;;  %v432_v55 = vld [vmem:[#allocation8 + $0x1e0] sm:$0xff] }
  0x76   :  { %886 = vmatpush1.bf16.msra.mxu1 %v885_v19  ;;  %v434_v56 = vld [vmem:[#allocation8 + $0x1f0] sm:$0xff]  ;;  %v899_v57 = vpack.c.bf16 %v435_v54, %v433_v52  ;;  %v536_v59 = vld [vmem:[#allocation8 + $0x208] sm:$0xff]  ;;  %v538_v60 = vld [vmem:[#allocation8 + $0x218] sm:$0xff] }
  0x77   :  { %888 = vmatprep.subr.bf16.mxu1 %v887_v21  ;;  %v901_v58 = vpack.c.bf16 %v434_v56, %v432_v55  ;;  %v903_v61 = vpack.c.bf16 %v538_v60, %v536_v59  ;;  %v667_v62 = vld [vmem:[#allocation8 + $0x308] sm:$0xff]  ;;  %v669_v63 = vld [vmem:[#allocation8 + $0x318] sm:$0xff]  ;;  %v535_v9 = vld [vmem:[#allocation8 + $0x200] sm:$0xff] }
  0x78   :  { %858 = vmatpush1.bf16.msra.mxu0 %v857_v20  ;;  %v935_v1 = vpack.c.bf16 %v669_v63, %v667_v62  ;;  %v1267_v5 = vld [vmem:[#allocation7] sm:$0xf]  ;;  %v537_v10 = vld [vmem:[#allocation8 + $0x210] sm:$0xff]  ;;  %v666_v11 = vld [vmem:[#allocation8 + $0x300] sm:$0xff] }
  0x79   :  { %860 = vmatprep.subr.bf16.mxu0 %v859_v25  ;;  %v107_v7 = vrot.slane %v1267_v5, %v1265_v4  ;;  %v111_v8 = vrot.slane %v1267_v5, %v1270_v6  ;;  %v668_v13 = vld [vmem:[#allocation8 + $0x310] sm:$0xff]  ;;  %v540_v14 = vld [vmem:[#allocation8 + $0x228] sm:$0xff]  ;;  %v542_v15 = vld [vmem:[#allocation8 + $0x238] sm:$0xff]  ;;  %v905_v21 = vpack.c.bf16 %v537_v10, %v535_v9 }
  0x7a   :  { %890 = vmatpush1.bf16.msra.mxu1 %v889_v31  ;;  %v671_v18 = vld [vmem:[#allocation8 + $0x328] sm:$0xff]  ;;  %v673_v19 = vld [vmem:[#allocation8 + $0x338] sm:$0xff]  ;;  %v937_v23 = vpack.c.bf16 %v668_v13, %v666_v11  ;;  %v907_v24 = vpack.c.bf16 %v542_v15, %v540_v14  ;;  %v539_v25 = vld [vmem:[#allocation8 + $0x220] sm:$0xff] }
  0x7b   :  { %892 = vmatprep.subr.bf16.mxu1 %v891_v33  ;;  %v541_v26 = vld [vmem:[#allocation8 + $0x230] sm:$0xff]  ;;  %v670_v27 = vld [vmem:[#allocation8 + $0x320] sm:$0xff]  ;;  %v939_v30 = vpack.c.bf16 %v673_v19, %v671_v18  ;;  %v546_v33 = vld [vmem:[#allocation8 + $0x258] sm:$0xff] }
  0x7c   :  { %862 = vmatpush1.bf16.msra.mxu0 %v861_v32  ;;  %v672_v31 = vld [vmem:[#allocation8 + $0x330] sm:$0xff]  ;;  %v544_v32 = vld [vmem:[#allocation8 + $0x248] sm:$0xff]  ;;  %v677_v36 = vld [vmem:[#allocation8 + $0x358] sm:$0xff] }
  0x7d   :  { %864 = vmatprep.subr.bf16.mxu0 %v863_v37  ;;  %v675_v35 = vld [vmem:[#allocation8 + $0x348] sm:$0xff]  ;;  %v909_v37 = vpack.c.bf16 %v541_v26, %v539_v25  ;;  %v941_v38 = vpack.c.bf16 %v672_v31, %v670_v27  ;;  %v911_v39 = vpack.c.bf16 %v546_v33, %v544_v32  ;;  %v543_v40 = vld [vmem:[#allocation8 + $0x240] sm:$0xff]  ;;  %v676_v44 = vld [vmem:[#allocation8 + $0x350] sm:$0xff]  ;;  %v114_v25 = vsub.s32 2, %v1262_v3 }
  0x7e   :  { %894 = vmatpush1.bf16.msra.mxu1 %v893_v41  ;;  %v545_v41 = vld [vmem:[#allocation8 + $0x250] sm:$0xff]  ;;  %v548_v45 = vld [vmem:[#allocation8 + $0x268] sm:$0xff]  ;;  %v681_v48 = vld [vmem:[#allocation8 + $0x378] sm:$0xff]  ;;  %v118_v27 = vsub.s32 3, %v1262_v3 }
  0x7f   :  { %896 = vmatprep.subr.bf16.mxu1 %v895_v43  ;;  %v943_v43 = vpack.c.bf16 %v677_v36, %v675_v35  ;;  %v679_v47 = vld [vmem:[#allocation8 + $0x368] sm:$0xff]  ;;  %v547_v52 = vld [vmem:[#allocation8 + $0x260] sm:$0xff]  ;;  %v680_v56 = vld [vmem:[#allocation8 + $0x370] sm:$0xff] }
  0x80   :  { %866 = vmatpush1.bf16.msra.mxu0 %v865_v42  ;;  %v674_v42 = vld [vmem:[#allocation8 + $0x340] sm:$0xff]  ;;  %v947_v55 = vpack.c.bf16 %v681_v48, %v679_v47  ;;  %v683_v59 = vld [vmem:[#allocation8 + $0x388] sm:$0xff]  ;;  %v685_v60 = vld [vmem:[#allocation8 + $0x398] sm:$0xff]  ;;  %v119_v3 = vrot.slane %v1267_v5, %v118_v27 }
  0x81   :  { %868 = vmatprep.subr.bf16.mxu0 %v867_v49  ;;  %v913_v49 = vpack.c.bf16 %v545_v41, %v543_v40  ;;  %v945_v50 = vpack.c.bf16 %v676_v44, %v674_v42  ;;  %v678_v54 = vld [vmem:[#allocation8 + $0x360] sm:$0xff]  ;;  %v556_v9 = vld [vmem:[#allocation8 + $0x2a8] sm:$0xff]  ;;  %v558_v10 = vld [vmem:[#allocation8 + $0x2b8] sm:$0xff] }
  0x82   :  { %898 = vmatpush1.bf16.msra.mxu1 %v897_v46  ;;  %v550_v46 = vld [vmem:[#allocation8 + $0x278] sm:$0xff]  ;;  %v551_v63 = vld [vmem:[#allocation8 + $0x280] sm:$0xff]  ;;  %v687_v11 = vld [vmem:[#allocation8 + $0x3a8] sm:$0xff]  ;;  %v923_v15 = vpack.c.bf16 %v558_v10, %v556_v9 }
  0x83   :  { %900 = vmatprep.subr.bf16.mxu1 %v899_v57  ;;  %v915_v51 = vpack.c.bf16 %v550_v46, %v548_v45  ;;  %v552_v57 = vld [vmem:[#allocation8 + $0x288] sm:$0xff]  ;;  %v682_v2 = vld [vmem:[#allocation8 + $0x380] sm:$0xff]  ;;  %v561_v32 = vld [vmem:[#allocation8 + $0x2d0] sm:$0xff] }
  0x84   :  { %870 = vmatpush1.bf16.msra.mxu0 %v869_v53  ;;  %v549_v53 = vld [vmem:[#allocation8 + $0x270] sm:$0xff]  ;;  %v686_v18 = vld [vmem:[#allocation8 + $0x3a0] sm:$0xff]  ;;  %v695_v40 = vld [vmem:[#allocation8 + $0x3e8] sm:$0xff] }
  0x85   :  { %904 = vmatprep.subr.bf16.mxu0 %v903_v61  ;;  %v917_v61 = vpack.c.bf16 %v549_v53, %v547_v52  ;;  %v559_v31 = vld [vmem:[#allocation8 + $0x2c0] sm:$0xff]  ;;  %v692_v36 = vld [vmem:[#allocation8 + $0x3d0] sm:$0xff]  ;;  %v697_v41 = vld [vmem:[#allocation8 + $0x3f8] sm:$0xff] }
  0x86   :  { %902 = vmatpush1.bf16.msra.mxu1 %v901_v58  ;;  %v554_v58 = vld [vmem:[#allocation8 + $0x298] sm:$0xff]  ;;  %v690_v33 = vld [vmem:[#allocation8 + $0x3c0] sm:$0xff]  ;;  %v929_v42 = vpack.c.bf16 %v561_v32, %v559_v31  ;;  %v565_v46 = vld [vmem:[#allocation8 + $0x2f0] sm:$0xff]  ;;  %v963_v47 = vpack.c.bf16 %v697_v41, %v695_v40 }
  0x87   :  { %936 = vmatprep.subr.bf16.mxu1 %v935_v1  ;;  %v919_v62 = vpack.c.bf16 %v554_v58, %v552_v57  ;;  %v553_v1 = vld [vmem:[#allocation8 + $0x290] sm:$0xff]  ;;  %v563_v45 = vld [vmem:[#allocation8 + $0x2e0] sm:$0xff] }
  0x88   :  { %v921_v13 = vpack.c.bf16 %v553_v1, %v551_v63  ;;  %v694_v48 = vld [vmem:[#allocation8 + $0x3e0] sm:$0xff]  ;;  %v933_v52 = vpack.c.bf16 %v565_v46, %v563_v45 }
 0x13a   :  { %v194_v12 = vpop.f32.mrb[0].mxu0 }
 0x13b   :  { %v195_v16 = vadd.f32 %v194_v12, %v107_v7  ;;  %v196_v17 = vpop.f32.mrb[1].mxu0  ;;  %v951_v7 = vpack.c.bf16 %v685_v60, %v683_v59  ;;  %v689_v12 = vld [vmem:[#allocation8 + $0x3b8] sm:$0xff] }
 0x13c   :  { %v197_v20 = vadd.f32 %v196_v17, %v111_v8  ;;  %v1276_v28 = vpop.f32.mrb[0].mxu1  ;;  %v684_v8 = vld [vmem:[#allocation8 + $0x390] sm:$0xff]  ;;  %v955_v19 = vpack.c.bf16 %v689_v12, %v687_v11 }
 0x13d   :  { %v270_v22 = vmax.f32 %v195_v16, 0.0  ;;  %v1278_v34 = vpop.f32.mrb[1].mxu1  ;;  %v953_v14 = vpack.c.bf16 %v684_v8, %v682_v2  ;;  %v555_v16 = vld [vmem:[#allocation8 + $0x2a0] sm:$0xff]  ;;  %v557_v17 = vld [vmem:[#allocation8 + $0x2b0] sm:$0xff] }
 0x13e   :  { %v271_v29 = vmax.f32 %v197_v20, 0.0  ;;  %v688_v20 = vld [vmem:[#allocation8 + $0x3b0] sm:$0xff]  ;;  %v925_v26 = vpack.c.bf16 %v557_v17, %v555_v16 }
 0x13f   :  { %383 = vmatmul.mubr.f32.vlgmr.msra.gmra.mrb[2].mxu0 %v270_v22  ;;  %v562_v22 = vld [vmem:[#allocation8 + $0x2d8] sm:$0xff] }
 0x140   :  { %906 = vmatpush1.bf16.msra.mxu0 %v905_v21  ;;  %514 = vmatmul.mubr.f32.vlgmr.msra.gmra.mrb[2].mxu1 %v271_v29  ;;  %v560_v21 = vld [vmem:[#allocation8 + $0x2c8] sm:$0xff]  ;;  %v957_v29 = vpack.c.bf16 %v688_v20, %v686_v18  ;;  %v699_v20 = vld [vmem:[#allocation10 + $0x6] sm:$0x3] }
 0x141   :  { %938 = vmatpush1.bf16.msra.mxu1 %v937_v23  ;;  %908 = vmatprep.subr.bf16.mxu0 %v907_v24  ;;  %v691_v23 = vld [vmem:[#allocation8 + $0x3c8] sm:$0xff]  ;;  %v693_v24 = vld [vmem:[#allocation8 + $0x3d8] sm:$0xff] }
 0x142   :  { %940 = vmatprep.subr.bf16.mxu1 %v939_v30  ;;  %644 = vmatprep.mubr.f32.mxu0 %v1161_v0  ;;  %v927_v30 = vpack.c.bf16 %v562_v22, %v560_v21  ;;  %v959_v35 = vpack.c.bf16 %v693_v24, %v691_v23 }
 0x143   :  { %775 = vmatprep.mubr.f32.mxu1 %v1161_v0  ;;  %v949_v0 = vpack.c.bf16 %v680_v56, %v678_v54  ;;  %v437_v56 = vld [vmem:[#allocation10 + $0x2] sm:$0x3] }
 0x144   :  { %910 = vmatpush1.bf16.msra.mxu0 %v909_v37  ;;  %v564_v37 = vld [vmem:[#allocation8 + $0x2e8] sm:$0xff]  ;;  %v442_v58 = vrot.slane %v437_v56, %v1265_v4 }
 0x145   :  { %942 = vmatpush1.bf16.msra.mxu1 %v941_v38  ;;  %912 = vmatprep.subr.bf16.mxu0 %v911_v39  ;;  %v566_v38 = vld [vmem:[#allocation8 + $0x2f8] sm:$0xff]  ;;  %v115_v39 = vrot.slane %v1267_v5, %v114_v25 }
 0x146   :  { %944 = vmatprep.subr.bf16.mxu1 %v943_v43  ;;  %v961_v43 = vpack.c.bf16 %v692_v36, %v690_v33  ;;  %v931_v44 = vpack.c.bf16 %v566_v38, %v564_v37 }
 0x148   :  { %914 = vmatpush1.bf16.msra.mxu0 %v913_v49  ;;  %v696_v49 = vld [vmem:[#allocation8 + $0x3f0] sm:$0xff] }
 0x149   :  { %946 = vmatpush1.bf16.msra.mxu1 %v945_v50  ;;  %916 = vmatprep.subr.bf16.mxu0 %v915_v51  ;;  %v266_v50 = vadd.f32 %v1276_v28, %v115_v39  ;;  %v268_v51 = vadd.f32 %v1278_v34, %v119_v3  ;;  %v965_v53 = vpack.c.bf16 %v696_v49, %v694_v48 }
 0x14a   :  { %948 = vmatprep.subr.bf16.mxu1 %v947_v55  ;;  %v306_v55 = vld [vmem:[#allocation10] sm:$0x3]  ;;  %v446_v34 = vrot.slane %v437_v56, %v1270_v6 }
 0x14b   :  { %v272_v5 = vmax.f32 %v266_v50, 0.0  ;;  %v273_v54 = vmax.f32 %v268_v51, 0.0  ;;  %v311_v57 = vrot.slane %v306_v55, %v1265_v4  ;;  %v315_v28 = vrot.slane %v306_v55, %v1270_v6 }
 0x14c   :  { %918 = vmatpush1.bf16.msra.mxu0 %v917_v61 }
 0x14d   :  { %950 = vmatpush1.bf16.msra.mxu1 %v949_v0  ;;  %920 = vmatprep.subr.bf16.mxu0 %v919_v62 }
 0x14e   :  { %952 = vmatprep.subr.bf16.mxu1 %v951_v7 }
 0x150   :  { %922 = vmatpush1.bf16.msra.mxu0 %v921_v13 }
 0x151   :  { %954 = vmatpush1.bf16.msra.mxu1 %v953_v14  ;;  %924 = vmatprep.subr.bf16.mxu0 %v923_v15 }
 0x152   :  { %956 = vmatprep.subr.bf16.mxu1 %v955_v19  ;;  %v568_v19 = vld [vmem:[#allocation10 + $0x4] sm:$0x3] }
 0x153   :  { %v573_v23 = vrot.slane %v568_v19, %v1265_v4  ;;  %v577_v25 = vrot.slane %v568_v19, %v1270_v6 }
 0x154   :  { %926 = vmatpush1.bf16.msra.mxu0 %v925_v26  ;;  %v704_v26 = vrot.slane %v699_v20, %v1265_v4 }
 0x155   :  { %958 = vmatpush1.bf16.msra.mxu1 %v957_v29  ;;  %928 = vmatprep.subr.bf16.mxu0 %v927_v30  ;;  %v708_v29 = vrot.slane %v699_v20, %v1270_v6 }
 0x156   :  { %960 = vmatprep.subr.bf16.mxu1 %v959_v35 }
 0x158   :  { %930 = vmatpush1.bf16.msra.mxu0 %v929_v42 }
 0x159   :  { %962 = vmatpush1.bf16.msra.mxu1 %v961_v43  ;;  %932 = vmatprep.subr.bf16.mxu0 %v931_v44 }
 0x15a   :  { %964 = vmatprep.subr.bf16.mxu1 %v963_v47 }
 0x15c   :  { %934 = vmatpush1.bf16.msra.mxu0 %v933_v52 }
 0x15d   :  { %966 = vmatpush1.bf16.msra.mxu1 %v965_v53 }
 0x15f   :  { %645 = vmatmul.mubr.f32.vlgmr.msra.gmra.mrb[4].mxu0 %v272_v5 }
 0x160   :  { %776 = vmatmul.mubr.f32.vlgmr.msra.gmra.mrb[4].mxu1 %v273_v54 }
 0x212   :  { %v384_v59 = vpop.f32.mrb[2].mxu0 }
 0x213   :  { %v385_v60 = vadd.f32 %v384_v59, %v311_v57  ;;  %v386_v61 = vpop.f32.mrb[3].mxu0  ;;  %v515_v0 = vpop.f32.mrb[2].mxu1 }
 0x214   :  { %v387_v62 = vadd.f32 %v386_v61, %v315_v28  ;;  %v516_v63 = vadd.f32 %v515_v0, %v442_v58  ;;  %v517_v1 = vpop.f32.mrb[3].mxu1 }
 0x215   :  { %v815_v2 = vmul.f32 -1.442695, %v385_v60  ;;  %v518_v7 = vadd.f32 %v517_v1, %v446_v34 }
 0x216   :  { %v816_v8 = vmul.f32 -1.442695, %v387_v62  ;;  %v817_v9 = vmul.f32 -1.442695, %v516_v63 }
 0x217   :  { %979 = vpow2.f32 %v815_v2  ;;  %v818_v10 = vmul.f32 -1.442695, %v518_v7 }
 0x218   :  { %981 = vpow2.f32 %v816_v8 }
 0x219   :  { %983 = vpow2.f32 %v817_v9 }
 0x21a   :  { %985 = vpow2.f32 %v818_v10 }
 0x221   :  { %v980_v11 = vpop.eup %979 }
 0x222   :  { %v982_v12 = vpop.eup %981  ;;  %v395_v13 = vadd.f32 1.0, %v980_v11 }
 0x223   :  { %v984_v14 = vpop.eup %983  ;;  %v396_v15 = vadd.f32 1.0, %v982_v12 }
 0x224   :  { %v986_v16 = vpop.eup %985  ;;  %987 = vrcp.f32 %v395_v13  ;;  %v526_v17 = vadd.f32 1.0, %v984_v14 }
 0x225   :  { %989 = vrcp.f32 %v396_v15  ;;  %v527_v18 = vadd.f32 1.0, %v986_v16 }
 0x226   :  { %991 = vrcp.f32 %v526_v17 }
 0x227   :  { %993 = vrcp.f32 %v527_v18 }
 0x22e   :  { %v988_v21 = vpop.eup %987 }
 0x22f   :  { %v990_v22 = vpop.eup %989  ;;  %401 = vst [vmem:[#allocation11] sm:$0xff] %v988_v21 }
 0x230   :  { %v992_v24 = vpop.eup %991  ;;  %402 = vst [vmem:[#allocation11 + $0x8] sm:$0xff] %v990_v22 }
 0x231   :  { %v994_v27 = vpop.eup %993  ;;  %532 = vst [vmem:[#allocation11 + $0x10] sm:$0xff] %v992_v24 }
 0x232   :  { %533 = vst [vmem:[#allocation11 + $0x18] sm:$0xff] %v994_v27  ;;  %v646_v30 = vpop.f32.mrb[4].mxu0 }
 0x233   :  { %v647_v31 = vadd.f32 %v646_v30, %v573_v23  ;;  %v648_v32 = vpop.f32.mrb[5].mxu0  ;;  %v777_v33 = vpop.f32.mrb[4].mxu1 }
 0x234   :  { %v649_v35 = vadd.f32 %v648_v32, %v577_v25  ;;  %v778_v36 = vadd.f32 %v777_v33, %v704_v26  ;;  %v779_v37 = vpop.f32.mrb[5].mxu1 }
 0x235   :  { %v819_v38 = vmul.f32 -1.442695, %v647_v31  ;;  %v780_v39 = vadd.f32 %v779_v37, %v708_v29 }
 0x236   :  { %v820_v40 = vmul.f32 -1.442695, %v649_v35  ;;  %v821_v41 = vmul.f32 -1.442695, %v778_v36 }
 0x237   :  { %995 = vpow2.f32 %v819_v38  ;;  %v822_v42 = vmul.f32 -1.442695, %v780_v39 }
 0x238   :  { %997 = vpow2.f32 %v820_v40 }
 0x239   :  { %999 = vpow2.f32 %v821_v41 }
 0x23a   :  { %1001 = vpow2.f32 %v822_v42 }
 0x241   :  { %v996_v4 = vpop.eup %995 }
 0x242   :  { %v998_v3 = vpop.eup %997  ;;  %v657_v6 = vadd.f32 1.0, %v996_v4 }
 0x243   :  { %v1000_v43 = vpop.eup %999  ;;  %v658_v44 = vadd.f32 1.0, %v998_v3 }
 0x244   :  { %v1002_v45 = vpop.eup %1001  ;;  %1003 = vrcp.f32 %v657_v6  ;;  %v788_v46 = vadd.f32 1.0, %v1000_v43 }
 0x245   :  { %1005 = vrcp.f32 %v658_v44  ;;  %v789_v47 = vadd.f32 1.0, %v1002_v45 }
 0x246   :  { %1007 = vrcp.f32 %v788_v46 }
 0x247   :  { %1009 = vrcp.f32 %v789_v47 }
 0x24e   :  { %v1004_v48 = vpop.eup %1003 }
 0x24f   :  { %v1006_v49 = vpop.eup %1005  ;;  %663 = vst [vmem:[#allocation11 + $0x20] sm:$0xff] %v1004_v48 }
 0x250   :  { %v1008_v50 = vpop.eup %1007  ;;  %664 = vst [vmem:[#allocation11 + $0x28] sm:$0xff] %v1006_v49 }
 0x251   :  { %v1010_v51 = vpop.eup %1009  ;;  %794 = vst [vmem:[#allocation11 + $0x30] sm:$0xff] %v1008_v50 }
 0x252   :  { %795 = vst [vmem:[#allocation11 + $0x38] sm:$0xff] %v1010_v51 }
 0x253   :  { %1132 = shalt.err (!%p1129_p2)
}
 0x254   :  { %s1133_s7 = scalar_lea.hbm %s1313_s5, 1024 }
 0x255   :  { %p1134_p3 = scmp.ne.s32.totalorder %s1313_s5, %s1133_s7  ;;  %p1137_p4 = scmp.lt.u32.totalorder %s1133_s7, %s1313_s5 }
 0x257   :  { %p1139_p5 = pnand %p1137_p4, %p1134_p3 }
 0x259   :  { %1142 = shalt.err (!%p1139_p5)
}
 0x25a   :  { %805 = dma.vmem_to_hbm [thread:$0]  %s803_s29, 1024, %s1313_s5, [#allocation4]  }
 0x25b   :  { %1149 = dma.done.wait [#allocation4], 1024  }
 0x25c   :  { %1150 = vsyncadd [#allocation4], 4294966272 }
 0x25d   :  { %809 = vsyncpa [#allocation3], 1 }
 0x25e   :  { %810 = vsyncpa [#allocation6], 1 }
 0x25f   :  { %811 = vsyncpa [#allocation9], 1 }
 0x260   :  { %812 = vsyncpa [#allocation4], 1 }

</bundles_post_ra>
